<compile_context>
chip_gen: v7x
topology: tpu7x:2x2x1
jax: 0.10.0
libtpu: 0.0.40
codegen_flags: <defaults>
</compile_context>

<pallas_src>
import math

import jax
import jax.numpy as jnp
from jax.experimental import pallas as pl
from jax.experimental.pallas import tpu as pltpu

# OGB get_bond_feature_dims() (hardcoded so the script is self-contained).
BOND_FEATURE_DIMS = [5, 6, 2]
NUM_FEATURES = len(BOND_FEATURE_DIMS)                 # 3
# Exclusive prefix sums: per-feature row offsets into the concatenated table.
OFFSETS = [0]
for _d in BOND_FEATURE_DIMS[:-1]:
    OFFSETS.append(OFFSETS[-1] + _d)                  # [0, 5, 11]
TOTAL_ROWS = sum(BOND_FEATURE_DIMS)                   # 13
TOTAL_PAD = ((TOTAL_ROWS + 127) // 128) * 128         # 128 (lane-aligned K dim)


def _round_up(x, m):
    return ((x + m - 1) // m) * m


def _bond_encoder_kernel(x_ref, tbl_ref, o_ref):
    """One grid step handles a tile of edges.

    x_ref:   (TILE_N, NUM_FEATURES) int32 raw per-feature categorical indices.
    tbl_ref: (TOTAL_PAD, EMB_DIM) float32 concatenated embedding tables,
             pre-scaled by 1/sqrt(NUM_FEATURES) in the wrapper.
    o_ref:   (TILE_N, EMB_DIM) float32.
    """
    x = x_ref[...]                                    # (TN, F) int32
    tn = x.shape[0]
    total_pad = tbl_ref.shape[0]                      # 128

    # Multi-hot matrix: row e has a 1 at each of its F (offset) indices.
    # The F column blocks are disjoint, so OR of boolean masks == their sum;
    # one cast to float at the end instead of F cast+add passes.
    col = jax.lax.broadcasted_iota(jnp.int32, (tn, total_pad), 1)
    hit = col == (x[:, 0:1] + OFFSETS[0])
    for i in range(1, NUM_FEATURES):                  # statically unrolled, F=3
        hit = hit | (col == (x[:, i:i + 1] + OFFSETS[i]))
    multi_hot = hit.astype(jnp.float32)               # (TN, TOTAL_PAD)

    # Sum of the F (pre-scaled) embedding rows per edge, via one MXU matmul.
    o_ref[...] = jnp.dot(multi_hot, tbl_ref[...],
                         preferred_element_type=jnp.float32)


def bond_encoder_avg(edge_attr, table, *, tile_n=1024):
    """edge_attr: [N, NUM_FEATURES] integer raw per-feature indices.
    table: [TOTAL_PAD, emb_dim] float32 concatenated embedding tables
           (NOT pre-scaled; scaling is folded in here).
    Returns [N, emb_dim] float32."""
    n, f = edge_attr.shape
    assert f == NUM_FEATURES
    assert table.shape[0] == TOTAL_PAD
    emb_dim = table.shape[1]

    # Fold the 1/sqrt(num_features) scale into the table once (tiny one-time
    # op) so the kernel has no per-tile VPU multiply.
    table = table * jnp.float32(1.0 / math.sqrt(NUM_FEATURES))

    # Tile size: large enough to amortize per-step overhead, clamped so the
    # grid has at least 2 steps whenever possible (v7x has 2 TensorCores and
    # the grid axis is marked "parallel").  Keep it a multiple of 8 (sublane).
    tile_n = max(8, min(tile_n, _round_up(pl.cdiv(n, 2), 8)))

    # Pad N internally to a multiple of tile_n; padded rows produce garbage
    # (index 0 per feature) and are sliced off below.
    n_pad = _round_up(n, tile_n)
    x = edge_attr.astype(jnp.int32)
    if n_pad != n:
        x = jnp.pad(x, ((0, n_pad - n), (0, 0)))

    grid = (n_pad // tile_n,)

    # Rough VMEM footprint (VMEM tiles are lane-padded to 128 regardless of
    # the logical last dim): double-buffered x + out blocks, resident table,
    # and ~4 tile-sized in-kernel temporaries (iota / masks / multi_hot).
    lane_w = _round_up(max(emb_dim, 1), 128)
    x_blk = tile_n * 128 * 4                       # (tile_n, 3) int32, lane-padded
    out_blk = tile_n * lane_w * 4
    tbl_b = TOTAL_PAD * lane_w * 4
    vmem_est = 2 * (x_blk + out_blk) + tbl_b + 4 * tile_n * 128 * 4
    vmem_limit = None
    if vmem_est > 12 * 1024 * 1024:                # exceeds v5e's 16 MiB default
        vmem_limit = min(vmem_est + (4 << 20), 100 * 1024 * 1024)

    cost = pl.CostEstimate(
        flops=2 * n_pad * TOTAL_PAD * emb_dim,
        transcendentals=0,
        bytes_accessed=(n_pad * NUM_FEATURES * 4
                        + TOTAL_PAD * emb_dim * 4
                        + n_pad * emb_dim * 4),
    )

    out = pl.pallas_call(
        _bond_encoder_kernel,
        out_shape=jax.ShapeDtypeStruct((n_pad, emb_dim), jnp.float32),
        grid_spec=pltpu.PrefetchScalarGridSpec(
            num_scalar_prefetch=0,
            grid=grid,
            in_specs=[
                # Per-step tile of edge indices.
                pl.BlockSpec((tile_n, NUM_FEATURES), lambda i: (i, 0)),
                # Whole (pre-scaled) table, constant index_map -> stays
                # resident in VMEM across grid steps (no re-DMA per step).
                pl.BlockSpec((TOTAL_PAD, emb_dim), lambda i: (0, 0)),
            ],
            # Native emb_dim output width: no column padding, no post-call
            # column slice, minimal HBM writeback.
            out_specs=pl.BlockSpec((tile_n, emb_dim), lambda i: (i, 0)),
        ),
        compiler_params=pltpu.CompilerParams(
            dimension_semantics=("parallel",),
            vmem_limit_bytes=vmem_limit,
        ),
        cost_estimate=cost,
    )(x, table)

    if n_pad != n:
        out = out[:n]
    return out


def init_params(emb_dim, key):
    """Xavier-uniform init for each per-feature embedding table, concatenated
    into one [TOTAL_PAD, emb_dim] float32 table (padded rows are zero)."""
    tables = []
    for dim in BOND_FEATURE_DIMS:
        key, sub = jax.random.split(key)
        bound = math.sqrt(6.0 / (dim + emb_dim))
        tables.append(
            jax.random.uniform(sub, (dim, emb_dim), jnp.float32, -bound, bound)
        )
    table = jnp.concatenate(tables, axis=0)                        # [13, emb_dim]
    table = jnp.pad(table, ((0, TOTAL_PAD - TOTAL_ROWS), (0, 0)))  # [128, emb_dim]
    return table


def reference(edge_attr, table):
    """Pure-JAX reference matching the PyTorch forward."""
    offsets = jnp.asarray(OFFSETS, dtype=jnp.int32)
    x_off = edge_attr.astype(jnp.int32) + offsets[None, :]
    acc = jnp.sum(table[x_off], axis=1)                            # [N, emb_dim]
    return acc / jnp.sqrt(jnp.float32(NUM_FEATURES))


if __name__ == "__main__":
    key = jax.random.PRNGKey(0)
    emb_dim = 32
    n_edges = 300          # not a multiple of tile_n on purpose (internal pad)

    k_tbl, k_x = jax.random.split(key)
    table = init_params(emb_dim, k_tbl)

    # Random valid categorical indices per bond-feature column.
    cols = []
    for dim in BOND_FEATURE_DIMS:
        k_x, sub = jax.random.split(k_x)
        cols.append(jax.random.randint(sub, (n_edges, 1), 0, dim, jnp.int32))
    edge_attr = jnp.concatenate(cols, axis=1)                      # [300, 3]

    out = bond_encoder_avg(edge_attr, table)
    out = jax.block_until_ready(out)

    ref = reference(edge_attr, table)
    assert out.shape == (n_edges, emb_dim)
    assert jnp.allclose(out, ref, atol=1e-5, rtol=1e-5), "mismatch vs reference"

    print("KERNEL_OK")
</pallas_src>

<mosaic_0001>
module attributes {stable_mosaic.version = 11 : i64} {
  func.func @_bond_encoder_kernel(%arg0: i32, %arg1: memref<152x3xi32, #tpu.memory_space<vmem>>, %arg2: memref<128x32xf32, #tpu.memory_space<vmem>>, %arg3: memref<152x32xf32, #tpu.memory_space<vmem>>) attributes {dimension_semantics = [#tpu.dimension_semantics<parallel>], iteration_bounds = array<i64: 2>, scalar_prefetch = 0 : i64, scratch_operands = 0 : i64, tpu.core_type = #tpu.core_type<tc>, window_params = [{transform_indices = @transform_0, window_bounds = array<i64: 152, 3>}, {pipeline_mode = #tpu.pipeline_mode<synchronous>, transform_indices = @transform_1, window_bounds = array<i64: 128, 32>}, {transform_indices = @transform_2, window_bounds = array<i64: 152, 32>}]} {
    %c0 = arith.constant 0 : index
    %c0_0 = arith.constant 0 : index
    %0 = vector.load %arg1[%c0, %c0_0] : memref<152x3xi32, #tpu.memory_space<vmem>>, vector<152x3xi32>
    %1 = tpu.iota {dimensions = array<i32: 1>} : vector<152x128xi32>
    %2 = vector.extract_strided_slice %0 {offsets = [0, 0], sizes = [152, 1], strides = [1, 1]} : vector<152x3xi32> to vector<152x1xi32>
    %c0_i32 = arith.constant 0 : i32
    %3 = vector.broadcast %c0_i32 : i32 to vector<152x1xi32>
    %4 = arith.addi %2, %3 : vector<152x1xi32>
    %5 = vector.broadcast %4 : vector<152x1xi32> to vector<152x128xi32>
    %6 = arith.cmpi eq, %1, %5 : vector<152x128xi32>
    %7 = vector.extract_strided_slice %0 {offsets = [0, 1], sizes = [152, 1], strides = [1, 1]} : vector<152x3xi32> to vector<152x1xi32>
    %c5_i32 = arith.constant 5 : i32
    %8 = vector.broadcast %c5_i32 : i32 to vector<152x1xi32>
    %9 = arith.addi %7, %8 : vector<152x1xi32>
    %10 = vector.broadcast %9 : vector<152x1xi32> to vector<152x128xi32>
    %11 = arith.cmpi eq, %1, %10 : vector<152x128xi32>
    %12 = arith.ori %6, %11 : vector<152x128xi1>
    %13 = vector.extract_strided_slice %0 {offsets = [0, 2], sizes = [152, 1], strides = [1, 1]} : vector<152x3xi32> to vector<152x1xi32>
    %c11_i32 = arith.constant 11 : i32
    %14 = vector.broadcast %c11_i32 : i32 to vector<152x1xi32>
    %15 = arith.addi %13, %14 : vector<152x1xi32>
    %16 = vector.broadcast %15 : vector<152x1xi32> to vector<152x128xi32>
    %17 = arith.cmpi eq, %1, %16 : vector<152x128xi32>
    %18 = arith.ori %12, %17 : vector<152x128xi1>
    %19 = arith.extui %18 : vector<152x128xi1> to vector<152x128xi32>
    %20 = arith.sitofp %19 : vector<152x128xi32> to vector<152x128xf32>
    %c0_1 = arith.constant 0 : index
    %c0_2 = arith.constant 0 : index
    %21 = vector.load %arg2[%c0_1, %c0_2] : memref<128x32xf32, #tpu.memory_space<vmem>>, vector<128x32xf32>
    %cst = arith.constant dense<0.000000e+00> : vector<152x32xf32>
    %22 = tpu.matmul %20, %21, %cst {dimension_numbers = #tpu.dot_dimension_numbers<[1], [0], [0], [1], [0, 0, 1, 1], [], []>} : vector<152x128xf32>, vector<128x32xf32>, vector<152x32xf32> -> vector<152x32xf32>
    %c0_3 = arith.constant 0 : index
    %c0_4 = arith.constant 0 : index
    %23 = vector.load %arg3[%c0_3, %c0_4] : memref<152x32xf32, #tpu.memory_space<vmem>>, vector<152x32xf32>
    tpu.vector_store %arg3[%c0_3, %c0_4], %22 {strides = array<i32>} : memref<152x32xf32, #tpu.memory_space<vmem>>, vector<152x32xf32>,
    return
  }
  func.func @transform_0(%arg0: i32) -> (i32, i32) {
    %c0_i32 = arith.constant 0 : i32
    %c0_i32_0 = arith.constant 0 : i32
    return %arg0, %c0_i32 : i32, i32
  }
  func.func @transform_1(%arg0: i32) -> (i32, i32) {
    %c0_i32 = arith.constant 0 : i32
    %c0_i32_0 = arith.constant 0 : i32
    %c0_i32_1 = arith.constant 0 : i32
    return %c0_i32, %c0_i32_0 : i32, i32
  }
  func.func @transform_2(%arg0: i32) -> (i32, i32) {
    %c0_i32 = arith.constant 0 : i32
    %c0_i32_0 = arith.constant 0 : i32
    return %arg0, %c0_i32 : i32, i32
  }
}

</mosaic_0001>

<bundles_post_ra>
// kernel: tpu_custom_call.1
= control target key start
LH: loop header
LB: loop body
LE: loop exit
PB: predicated region body
PF: predicated region fallthrough
CT: control target
= control target key end

     0   :  { %s1049_s9 = smov 0   ;;  %s1409_s0 = inlined_call_operand.vmem [shape: s32[304,3], index: 0, kind: input, shape index: {}]   ;;  %s1410_s1 = inlined_call_operand.vmem [shape: f32[128,32], index: 1, kind: input, shape index: {}]   ;;  %s1411_s2 = inlined_call_operand.vmem [shape: f32[304,32], index: 2, kind: output, shape index: {}]  }
   0x1 LB: > { %s762_s10 = sadd.s32 4294967295, %s1025_s9   ;;  %p766_p0 = scmp.ge.s32.totalorder %s1025_s9, 1  ;;  %s1025_s9 = sphi %s1049_s9, %s12_s9  }
   0x2   : > { %p113_p1 = scmp.lt.s32.totalorder %s1025_s9, 3 }
   0x4   : > { %p114_p2 = pnand %p766_p0, %p113_p1 }
   0x5   : > { %s135_s11 = smul.u32 (!%p114_p2), 19, %s762_s10  ;;  %v510_v0 = vld [vmem:[%s1410_s1] sm:$0xff] (!%p114_p2)  ;;  %v1027_v1 = vmov (!%p114_p2), 0   ;;  %v1028_v2 = vmov (!%p114_p2), 1   ;;  %v511_v3 = vld [vmem:[%s1410_s1 + $0x8] sm:$0xff] (!%p114_p2)  ;;  %v512_v4 = vld [vmem:[%s1410_s1 + $0x10] sm:$0xff] (!%p114_p2) }
   0x6   : > { %117 = sbr.rel (%p114_p2) target bundleno = 531 (0x213), region = 28  ;;  %988 = vset.pattern.permute.xlu1 (!%p114_p2), %v1027_v1  ;;  %989 = vset.pattern.permute.xlu0 (!%p114_p2), %v1028_v2  ;;  %v513_v5 = vld [vmem:[%s1410_s1 + $0x18] sm:$0xff] (!%p114_p2)  ;;  %v1029_v6 = vmov (!%p114_p2), 0.0|0.0   ;;  %v934_v7 = vpack.c.bf16 (!%p114_p2), %v511_v3, %v510_v0  ;;  %v514_v9 = vld [vmem:[%s1410_s1 + $0x20] sm:$0xff] (!%p114_p2)  ;;  %v515_v10 = vld [vmem:[%s1410_s1 + $0x28] sm:$0xff] (!%p114_p2)  ;;  %v1030_v24 = vmov (!%p114_p2), 2  }
   0x7   : > { %p136_p3 = scmp.lt.s32.totalorder (!%p114_p2), %s135_s11, 37  ;;  %933 = vmatprep.subr.bf16.mxu0 (!%p114_p2), %v1029_v6  ;;  %957 = vmatprep.subr.bf16.mxu1 (!%p114_p2), %v1029_v6  ;;  %v937_v8 = vpack.c.bf16 (!%p114_p2), %v513_v5, %v512_v4  ;;  %v940_v13 = vpack.c.bf16 (!%p114_p2), %v515_v10, %v514_v9  ;;  %v516_v15 = vld [vmem:[%s1410_s1 + $0x30] sm:$0xff] (!%p114_p2)  ;;  %v517_v16 = vld [vmem:[%s1410_s1 + $0x38] sm:$0xff] (!%p114_p2)  ;;  %v518_v20 = vld [vmem:[%s1410_s1 + $0x40] sm:$0xff] (!%p114_p2)  ;;  %vm1031_vm0 = vmmov (!%p114_p2), 0   ;;  %v1032_v32 = vmov (!%p114_p2), 0.0  }
   0x8   : > { %935 = vmatpush3.bf16.msra.mxu0 (!%p114_p2), %v934_v7  ;;  %965 = vmatpush3.bf16.msra.mxu1 (!%p114_p2), %v934_v7  ;;  %v943_v19 = vpack.c.bf16 (!%p114_p2), %v517_v16, %v516_v15  ;;  %v519_v21 = vld [vmem:[%s1410_s1 + $0x48] sm:$0xff] (!%p114_p2)  ;;  %v520_v25 = vld [vmem:[%s1410_s1 + $0x50] sm:$0xff] (!%p114_p2)  ;;  %v521_v26 = vld [vmem:[%s1410_s1 + $0x58] sm:$0xff] (!%p114_p2) }
   0x9   : > { %936 = vmatprep.subr.bf16.mxu0 (!%p114_p2), %v1029_v6  ;;  %958 = vmatprep.subr.bf16.mxu1 (!%p114_p2), %v1029_v6  ;;  %v946_v23 = vpack.c.bf16 (!%p114_p2), %v519_v21, %v518_v20  ;;  %v949_v28 = vpack.c.bf16 (!%p114_p2), %v521_v26, %v520_v25  ;;  %v522_v30 = vld [vmem:[%s1410_s1 + $0x60] sm:$0xff] (!%p114_p2)  ;;  %v523_v31 = vld [vmem:[%s1410_s1 + $0x68] sm:$0xff] (!%p114_p2)  ;;  %v524_v36 = vld [vmem:[%s1410_s1 + $0x70] sm:$0xff] (!%p114_p2)  ;;  %v166_v20 = vlaneseq (!%p114_p2) }
   0xa   : > { %876 = vmatprep.mubr.msk.f32.mxu0 (!%p114_p2), %vm1031_vm0, %v1032_v32  ;;  %v952_v35 = vpack.c.bf16 (!%p114_p2), %v523_v31, %v522_v30  ;;  %v525_v37 = vld [vmem:[%s1410_s1 + $0x78] sm:$0xff] (!%p114_p2)  ;;  %906 = vmatprep.mubr.msk.f32.mxu1 (!%p114_p2), %vm1031_vm0, %v1032_v32 }
   0xb   : > { %v955_v39 = vpack.c.bf16 (!%p114_p2), %v525_v37, %v524_v36 }
   0xc   : > { %938 = vmatpush3.bf16.msra.mxu0 (!%p114_p2), %v937_v8  ;;  %966 = vmatpush3.bf16.msra.mxu1 (!%p114_p2), %v937_v8 }
   0xd   : > { %s1413_s11 = smov (!%p136_p3, %s135_s11), 37  ;;  %939 = vmatprep.subr.bf16.mxu0 %v1029_v6  ;;  %959 = vmatprep.subr.bf16.mxu1 %v1029_v6 }
   0xe   : > { %s767_s24 = sshll.u32 %s1413_s11, 3 }
   0xf   : > { %s1089_s27 = scalar_lea.vmem %s1409_s0, %s767_s24  ;;  %s1366_s25 = scalar_lea.vmem %s1411_s2, %s767_s24 }
  0x10   : > { %v1092_v11 = vld [vmem:[%s1089_s27 + $0x8] sm:$0xff]  ;;  %v147_v12 = vld [vmem:[%s1089_s27] sm:$0xff]  ;;  %v157_v17 = vld [vmem:[%s1089_s27 + $0x50] sm:$0xff]  ;;  %941 = vmatpush3.bf16.msra.mxu0 %v940_v13  ;;  %967 = vmatpush3.bf16.msra.mxu1 %v940_v13 }
  0x11   : > { %172 = vperm.xlu1 %988, %v1092_v11   ;;  %v244_v14 = vadd.s32 5, %v147_v12  ;;  %v245_v18 = vadd.s32 5, %v1092_v11  ;;  %942 = vmatprep.subr.bf16.mxu0 %v1029_v6  ;;  %v358_v22 = vadd.s32 11, %v147_v12  ;;  %v254_v27 = vadd.s32 5, %v157_v17  ;;  %v158_v29 = vld [vmem:[%s1089_s27 + $0x58] sm:$0xff]  ;;  %v159_v34 = vld [vmem:[%s1089_s27 + $0x60] sm:$0xff] }
  0x12   : > { %960 = vmatprep.subr.bf16.mxu1 %v1029_v6  ;;  %v368_v33 = vadd.s32 11, %v157_v17  ;;  %v1149_v38 = vld [vmem:[%s1089_s27 + $0x68] sm:$0xff]  ;;  %v149_v40 = vld [vmem:[%s1089_s27 + $0x10] sm:$0xff]  ;;  %v1162_v43 = vld [vmem:[%s1089_s27 + $0x78] sm:$0xff]  ;;  %v255_v44 = vadd.s32 5, %v158_v29  ;;  %v369_v46 = vadd.s32 11, %v158_v29 }
  0x13   : > { %264 = vperm.xlu0 %989, %v244_v14   ;;  %v1157_v41 = vld [vmem:[%s1089_s27 + $0x70] sm:$0xff]  ;;  %v246_v42 = vadd.s32 5, %v149_v40  ;;  %v1166_v45 = vld [vmem:[%s1089_s27 + $0x80] sm:$0xff]  ;;  %v1170_v47 = vld [vmem:[%s1089_s27 + $0x88] sm:$0xff]  ;;  %v359_v51 = vadd.s32 11, %v1092_v11  ;;  %v256_v52 = vadd.s32 5, %v159_v34 }
  0x14   : > { %944 = vmatpush3.bf16.msra.mxu0 %v943_v19  ;;  %968 = vmatpush3.bf16.msra.mxu1 %v943_v19  ;;  %v150_v48 = vld [vmem:[%s1089_s27 + $0x18] sm:$0xff]  ;;  %v1176_v49 = vld [vmem:[%s1089_s27 + $0x90] sm:$0xff]  ;;  %v360_v53 = vadd.s32 11, %v149_v40  ;;  %v370_v55 = vadd.s32 11, %v159_v34  ;;  %v151_v56 = vld [vmem:[%s1089_s27 + $0x20] sm:$0xff]  ;;  %v257_v63 = vadd.s32 5, %v1149_v38 }
  0x15   : > { %199 = vperm.xlu1 %988, %v157_v17   ;;  %945 = vmatprep.subr.bf16.mxu0 %v1029_v6  ;;  %v247_v50 = vadd.s32 5, %v150_v48  ;;  %v361_v54 = vadd.s32 11, %v150_v48  ;;  %v362_v57 = vadd.s32 11, %v151_v56  ;;  %v152_v58 = vld [vmem:[%s1089_s27 + $0x28] sm:$0xff]  ;;  %v248_v60 = vadd.s32 5, %v151_v56  ;;  %v153_v61 = vld [vmem:[%s1089_s27 + $0x30] sm:$0xff] }
  0x16   : > { %961 = vmatprep.subr.bf16.mxu1 %v1029_v6  ;;  %v363_v59 = vadd.s32 11, %v152_v58  ;;  %v364_v62 = vadd.s32 11, %v153_v61  ;;  %v154_v0 = vld [vmem:[%s1089_s27 + $0x38] sm:$0xff]  ;;  %v155_v4 = vld [vmem:[%s1089_s27 + $0x40] sm:$0xff]  ;;  %v371_v5 = vadd.s32 11, %v1149_v38  ;;  %v1194_v7 = vld [vmem:[%s1089_s27 + $0x48] sm:$0xff] }
  0x17   : > { %267 = vperm.xlu0 %989, %v245_v18   ;;  %v365_v3 = vadd.s32 11, %v154_v0  ;;  %v367_v8 = vadd.s32 11, %v1194_v7  ;;  %v249_v9 = vadd.s32 5, %v152_v58  ;;  %v258_v10 = vadd.s32 5, %v1157_v41 }
  0x18   : > { %947 = vmatpush3.bf16.msra.mxu0 %v946_v23  ;;  %969 = vmatpush3.bf16.msra.mxu1 %v946_v23  ;;  %v372_v11 = vadd.s32 11, %v1157_v41  ;;  %v259_v13 = vadd.s32 5, %v1162_v43  ;;  %v373_v14 = vadd.s32 11, %v1162_v43  ;;  %v251_v15 = vadd.s32 5, %v154_v0 }
  0x19   : > { %990 = vset.pattern.permute.xlu1 %v1030_v24  ;;  %948 = vmatprep.subr.bf16.mxu0 %v1029_v6  ;;  %v260_v16 = vadd.s32 5, %v1166_v45  ;;  %v374_v19 = vadd.s32 11, %v1166_v45  ;;  %v1217_v23 = vand.u32 127, %v166_v20  ;;  %v261_v31 = vadd.s32 5, %v1170_v47 }
  0x1a   : > { %378 = vperm.xlu1 %990, %v358_v22   ;;  %962 = vmatprep.subr.bf16.mxu1 %v1029_v6 }
  0x1b   : > { %991 = vset.pattern.permute.xlu0 %v1027_v1 }
  0x1c   : > { %169 = vperm.xlu0 %991, %v147_v12   ;;  %950 = vmatpush3.bf16.msra.mxu0 %v949_v28  ;;  %v250_v12 = vadd.s32 5, %v153_v61 }
  0x1d   : > { %951 = vmatprep.subr.bf16.mxu0 %v1029_v6  ;;  %970 = vmatpush3.bf16.msra.mxu1 %v949_v28 }
  0x1e   : > { %992 = vset.pattern.permute.xlu1 %v1028_v2  ;;  %963 = vmatprep.subr.bf16.mxu1 %v1029_v6 }
  0x1f   : > { %294 = vperm.xlu1 %992, %v254_v27   ;;  %v252_v27 = vadd.s32 5, %v155_v4 }
  0x20   : > { %202 = vperm.xlu0 %991, %v158_v29   ;;  %953 = vmatpush3.bf16.msra.mxu0 %v952_v35  ;;  %v1033_v29 = vmov 1.0  }
  0x21   : > { %971 = vmatpush3.bf16.msra.mxu1 %v952_v35  ;;  %954 = vmatprep.subr.bf16.mxu0 %v1029_v6  ;;  %v375_v35 = vadd.s32 11, %v1170_v47 }
  0x22   : > { %964 = vmatprep.subr.bf16.mxu1 %v1029_v6  ;;  %v366_v6 = vadd.s32 11, %v155_v4 }
  0x23   : > { %993 = vset.pattern.permute.xlu1 %v1030_v24 }
  0x24   : > { %408 = vperm.xlu1 %993, %v368_v33   ;;  %205 = vperm.xlu0 %991, %v159_v34  }
  0x25   : > { %956 = vmatpush3.bf16.msra.mxu0 %v955_v39  ;;  %972 = vmatpush3.bf16.msra.mxu1 %v955_v39 }
  0x28   : > { %994 = vset.pattern.permute.xlu1 %v1027_v1  ;;  %208 = vperm.xlu0 %991, %v1149_v38  }
  0x29   : > { %175 = vperm.xlu1 %994, %v149_v40  }
  0x2c   : > { %211 = vperm.xlu0 %991, %v1157_v41   ;;  %v253_v41 = vadd.s32 5, %v1194_v7 }
  0x2d   : > { %995 = vset.pattern.permute.xlu1 %v1028_v2 }
  0x2e   : > { %270 = vperm.xlu1 %995, %v246_v42  }
  0x30   : > { %214 = vperm.xlu0 %991, %v1162_v43  }
  0x32   : > { %297 = vperm.xlu1 %995, %v255_v44   ;;  %v262_v44 = vadd.s32 5, %v1176_v49 }
  0x34   : > { %217 = vperm.xlu0 %991, %v1166_v45  }
  0x36   : > { %996 = vset.pattern.permute.xlu1 %v1030_v24 }
  0x37   : > { %411 = vperm.xlu1 %996, %v369_v46   ;;  %v376_v46 = vadd.s32 11, %v1176_v49 }
  0x38   : > { %220 = vperm.xlu0 %991, %v1170_v47  }
  0x3b   : > { %997 = vset.pattern.permute.xlu1 %v1027_v1 }
  0x3c   : > { %178 = vperm.xlu1 %997, %v150_v48   ;;  %223 = vperm.xlu0 %991, %v1176_v49  }
  0x40   : > { %998 = vset.pattern.permute.xlu1 %v1028_v2  ;;  %1016 = vset.pattern.permute.xlu0 %v1030_v24 }
  0x41   : > { %273 = vperm.xlu1 %998, %v247_v50   ;;  %381 = vperm.xlu0 %1016, %v359_v51  }
  0x45   : > { %300 = vperm.xlu1 %998, %v256_v52   ;;  %384 = vperm.xlu0 %1016, %v360_v53  }
  0x49   : > { %999 = vset.pattern.permute.xlu1 %v1030_v24  ;;  %387 = vperm.xlu0 %1016, %v361_v54  }
  0x4a   : > { %414 = vperm.xlu1 %999, %v370_v55  }
  0x4d   : > { %390 = vperm.xlu0 %1016, %v362_v57  }
  0x4e   : > { %1000 = vset.pattern.permute.xlu1 %v1027_v1 }
  0x4f   : > { %181 = vperm.xlu1 %1000, %v151_v56  }
  0x51   : > { %393 = vperm.xlu0 %1016, %v363_v59  }
  0x53   : > { %1001 = vset.pattern.permute.xlu1 %v1028_v2 }
  0x54   : > { %276 = vperm.xlu1 %1001, %v248_v60  }
  0x55   : > { %396 = vperm.xlu0 %1016, %v364_v62  }
  0x58   : > { %303 = vperm.xlu1 %1001, %v257_v63  }
  0x59   : > { %399 = vperm.xlu0 %1016, %v365_v3  }
  0x5c   : > { %1002 = vset.pattern.permute.xlu1 %v1030_v24 }
  0x5d   : > { %417 = vperm.xlu1 %1002, %v371_v5   ;;  %402 = vperm.xlu0 %1016, %v366_v6  }
  0x61   : > { %1003 = vset.pattern.permute.xlu1 %v1027_v1  ;;  %405 = vperm.xlu0 %1016, %v367_v8  }
  0x62   : > { %184 = vperm.xlu1 %1003, %v152_v58  }
  0x66   : > { %1004 = vset.pattern.permute.xlu1 %v1028_v2 }
  0x67   : > { %279 = vperm.xlu1 %1004, %v249_v9  }
  0x6b   : > { %306 = vperm.xlu1 %1004, %v258_v10  }
  0x6f   : > { %1005 = vset.pattern.permute.xlu1 %v1030_v24 }
  0x70   : > { %420 = vperm.xlu1 %1005, %v372_v11  }
  0x74   : > { %1006 = vset.pattern.permute.xlu1 %v1027_v1 }
  0x75   : > { %187 = vperm.xlu1 %1006, %v153_v61  }
  0x79   : > { %1007 = vset.pattern.permute.xlu1 %v1028_v2 }
  0x7a   : > { %282 = vperm.xlu1 %1007, %v250_v12  }
  0x7e   : > { %309 = vperm.xlu1 %1007, %v259_v13  }
  0x82   : > { %1008 = vset.pattern.permute.xlu1 %v1030_v24 }
  0x83   : > { %423 = vperm.xlu1 %1008, %v373_v14  }
  0x87   : > { %1009 = vset.pattern.permute.xlu1 %v1027_v1 }
  0x88   : > { %190 = vperm.xlu1 %1009, %v154_v0  }
  0x8c   : > { %1010 = vset.pattern.permute.xlu1 %v1028_v2 }
  0x8d   : > { %285 = vperm.xlu1 %1010, %v251_v15  }
  0x90   : > { %v1211_v17 = vpop.permute.xlu1 %172 }
  0x91   : > { %312 = vperm.xlu1 %1010, %v260_v16  }
  0x92   : > { %v265_v18 = vpop.permute.xlu0 %264 }
  0x93   : > { %vm320_vm1 = vcmp.eq.s32.totalorder %v1217_v23, %v265_v18 }
  0x94   : > { %v200_v21 = vpop.permute.xlu1 %199 }
  0x95   : > { %1011 = vset.pattern.permute.xlu1 %v1030_v24  ;;  %vm235_vm7 = vcmp.eq.s32.totalorder %v1217_v23, %v200_v21 }
  0x96   : > { %426 = vperm.xlu1 %1011, %v374_v19   ;;  %v1215_v22 = vpop.permute.xlu0 %267 }
  0x99   : > { %v379_v25 = vpop.permute.xlu1 %378 }
  0x9a   : > { %1012 = vset.pattern.permute.xlu1 %v1027_v1  ;;  %vm434_vm3 = vcmp.eq.s32.totalorder %v1217_v23, %v379_v25 }
  0x9b   : > { %193 = vperm.xlu1 %1012, %v155_v4   ;;  %v170_v26 = vpop.permute.xlu0 %169 }
  0x9c   : > { %vm225_vm2 = vcmp.eq.s32.totalorder %v1217_v23, %v170_v26 }
  0x9d   : > { %vm339_vm4 = vmor %vm225_vm2, %vm320_vm1  ;;  %vm321_vm1 = vcmp.eq.s32.totalorder %v1217_v23, %v1215_v22  ;;  %vm226_vm2 = vcmp.eq.s32.totalorder %v1217_v23, %v1211_v17 }
  0x9e   : > { %vm453_vm5 = vmor %vm339_vm4, %vm434_vm3  ;;  %v295_v28 = vpop.permute.xlu1 %294 }
  0x9f   : > { %1013 = vset.pattern.permute.xlu1 %v1028_v2  ;;  %877 = vmatmul.mubr.msk.f32.vlgmr.msra.gmra.mrb[0].mxu0 %vm453_vm5, %v1033_v29  ;;  %v203_v30 = vpop.permute.xlu0 %202  ;;  %vm330_vm6 = vcmp.eq.s32.totalorder %v1217_v23, %v295_v28  ;;  %vm340_vm4 = vmor %vm226_vm2, %vm321_vm1 }
  0xa0   : > { %288 = vperm.xlu1 %1013, %v252_v27   ;;  %879 = vmatprep.mubr.msk.f32.mxu0 %vm1031_vm0, %v1032_v32  ;;  %vm349_vm8 = vmor %vm235_vm7, %vm330_vm6  ;;  %vm236_vm11 = vcmp.eq.s32.totalorder %v1217_v23, %v203_v30 }
  0xa3   : > { %v409_v33 = vpop.permute.xlu1 %408  ;;  %v206_v34 = vpop.permute.xlu0 %205 }
  0xa4   : > { %vm444_vm9 = vcmp.eq.s32.totalorder %v1217_v23, %v409_v33  ;;  %315 = vperm.xlu1 %1013, %v261_v31  }
  0xa5   : > { %vm463_vm10 = vmor %vm349_vm8, %vm444_vm9 }
  0xa6   : > { %907 = vmatmul.mubr.msk.f32.vlgmr.msra.gmra.mrb[0].mxu1 %vm463_vm10, %v1033_v29  ;;  %vm237_vm10 = vcmp.eq.s32.totalorder %v1217_v23, %v206_v34 }
  0xa7   : > { %v1233_v36 = vpop.permute.xlu0 %208  ;;  %909 = vmatprep.mubr.msk.f32.mxu1 %vm1031_vm0, %v1032_v32 }
  0xa8   : > { %1014 = vset.pattern.permute.xlu1 %v1030_v24  ;;  %v176_v37 = vpop.permute.xlu1 %175 }
  0xa9   : > { %429 = vperm.xlu1 %1014, %v375_v35   ;;  %vm227_vm7 = vcmp.eq.s32.totalorder %v1217_v23, %v176_v37 }
  0xab   : > { %v1238_v38 = vpop.permute.xlu0 %211 }
  0xad   : > { %1015 = vset.pattern.permute.xlu1 %v1027_v1  ;;  %v271_v39 = vpop.permute.xlu1 %270 }
  0xae   : > { %196 = vperm.xlu1 %1015, %v1194_v7   ;;  %vm322_vm5 = vcmp.eq.s32.totalorder %v1217_v23, %v271_v39 }
  0xaf   : > { %v1242_v40 = vpop.permute.xlu0 %214 }
  0xb1   : > { %v298_v42 = vpop.permute.xlu1 %297 }
  0xb2   : > { %1017 = vset.pattern.permute.xlu1 %v1028_v2  ;;  %vm331_vm12 = vcmp.eq.s32.totalorder %v1217_v23, %v298_v42 }
  0xb3   : > { %291 = vperm.xlu1 %1017, %v253_v41   ;;  %v1246_v43 = vpop.permute.xlu0 %217  ;;  %vm350_vm13 = vmor %vm236_vm11, %vm331_vm12 }
  0xb4   : > { %vm341_vm11 = vmor %vm227_vm7, %vm322_vm5 }
  0xb6   : > { %v412_v1 = vpop.permute.xlu1 %411 }
  0xb7   : > { %vm445_vm14 = vcmp.eq.s32.totalorder %v1217_v23, %v412_v1  ;;  %318 = vperm.xlu1 %1017, %v262_v44   ;;  %v1252_v45 = vpop.permute.xlu0 %220 }
  0xb8   : > { %vm464_vm15 = vmor %vm350_vm13, %vm445_vm14 }
  0xb9   : > { %910 = vmatmul.mubr.msk.f32.gmra.mrb[2].mxu1 %vm464_vm15, %v1033_v29 }
  0xba   : > { %912 = vmatprep.mubr.msk.f32.mxu1 %vm1031_vm0, %v1032_v32 }
  0xbb   : > { %1018 = vset.pattern.permute.xlu1 %v1030_v24  ;;  %v179_v2 = vpop.permute.xlu1 %178  ;;  %v1259_v47 = vpop.permute.xlu0 %223 }
  0xbc   : > { %432 = vperm.xlu1 %1018, %v376_v46   ;;  %vm228_vm13 = vcmp.eq.s32.totalorder %v1217_v23, %v179_v2 }
  0xc0   : > { %v274_v48 = vpop.permute.xlu1 %273  ;;  %v382_v50 = vpop.permute.xlu0 %381 }
  0xc1   : > { %vm435_vm3 = vcmp.eq.s32.totalorder %v1217_v23, %v382_v50  ;;  %vm323_vm8 = vcmp.eq.s32.totalorder %v1217_v23, %v274_v48 }
  0xc2   : > { %vm454_vm6 = vmor %vm340_vm4, %vm435_vm3 }
  0xc3   : > { %880 = vmatmul.mubr.msk.f32.gmra.mrb[2].mxu0 %vm454_vm6, %v1033_v29  ;;  %vm342_vm15 = vmor %vm228_vm13, %vm323_vm8 }
  0xc4   : > { %v301_v24 = vpop.permute.xlu1 %300  ;;  %v385_v49 = vpop.permute.xlu0 %384  ;;  %882 = vmatprep.mubr.msk.f32.mxu0 %vm1031_vm0, %v1032_v32 }
  0xc5   : > { %vm436_vm9 = vcmp.eq.s32.totalorder %v1217_v23, %v385_v49  ;;  %vm332_vm12 = vcmp.eq.s32.totalorder %v1217_v23, %v301_v24 }
  0xc6   : > { %vm455_vm14 = vmor %vm341_vm11, %vm436_vm9  ;;  %vm238_vm11 = vcmp.eq.s32.totalorder %v1217_v23, %v1233_v36 }
  0xc7   : > { %883 = vmatmul.mubr.msk.f32.gmra.mrb[4].mxu0 %vm455_vm14, %v1033_v29  ;;  %vm351_vm1 = vmor %vm237_vm10, %vm332_vm12 }
  0xc8   : > { %v388_v51 = vpop.permute.xlu0 %387  ;;  %885 = vmatprep.mubr.msk.f32.mxu0 %vm1031_vm0, %v1032_v32 }
  0xc9   : > { %vm437_vm2 = vcmp.eq.s32.totalorder %v1217_v23, %v388_v51  ;;  %v415_v52 = vpop.permute.xlu1 %414 }
  0xca   : > { %vm456_vm3 = vmor %vm342_vm15, %vm437_vm2  ;;  %vm446_vm4 = vcmp.eq.s32.totalorder %v1217_v23, %v415_v52 }
  0xcb   : > { %vm465_vm5 = vmor %vm351_vm1, %vm446_vm4  ;;  %886 = vmatmul.mubr.msk.f32.gmra.mrb[6].mxu0 %vm456_vm3, %v1033_v29 }
  0xcc   : > { %913 = vmatmul.mubr.msk.f32.gmra.mrb[4].mxu1 %vm465_vm5, %v1033_v29  ;;  %888 = vmatprep.mubr.msk.f32.mxu0 %vm1031_vm0, %v1032_v32  ;;  %v391_v54 = vpop.permute.xlu0 %390 }
  0xcd   : > { %915 = vmatprep.mubr.msk.f32.mxu1 %vm1031_vm0, %v1032_v32  ;;  %vm438_vm6 = vcmp.eq.s32.totalorder %v1217_v23, %v391_v54 }
  0xce   : > { %v182_v53 = vpop.permute.xlu1 %181 }
  0xcf   : > { %vm229_vm7 = vcmp.eq.s32.totalorder %v1217_v23, %v182_v53 }
  0xd0   : > { %v394_v59 = vpop.permute.xlu0 %393 }
  0xd1   : > { %vm439_vm1 = vcmp.eq.s32.totalorder %v1217_v23, %v394_v59 }
  0xd3   : > { %v277_v55 = vpop.permute.xlu1 %276 }
  0xd4   : > { %vm324_vm8 = vcmp.eq.s32.totalorder %v1217_v23, %v277_v55  ;;  %v397_v0 = vpop.permute.xlu0 %396 }
  0xd5   : > { %vm343_vm9 = vmor %vm229_vm7, %vm324_vm8 }
  0xd6   : > { %vm457_vm10 = vmor %vm343_vm9, %vm438_vm6  ;;  %vm239_vm6 = vcmp.eq.s32.totalorder %v1217_v23, %v1238_v38 }
  0xd7   : > { %v304_v56 = vpop.permute.xlu1 %303  ;;  %889 = vmatmul.mubr.msk.f32.gmra.mrb[8].mxu0 %vm457_vm10, %v1033_v29 }
  0xd8   : > { %891 = vmatprep.mubr.msk.f32.mxu0 %vm1031_vm0, %v1032_v32  ;;  %vm333_vm12 = vcmp.eq.s32.totalorder %v1217_v23, %v304_v56  ;;  %v400_v7 = vpop.permute.xlu0 %399 }
  0xd9   : > { %vm352_vm13 = vmor %vm238_vm11, %vm333_vm12  ;;  %vm440_vm11 = vcmp.eq.s32.totalorder %v1217_v23, %v397_v0 }
  0xdc   : > { %v418_v57 = vpop.permute.xlu1 %417  ;;  %v403_v13 = vpop.permute.xlu0 %402 }
  0xdd   : > { %vm447_vm14 = vcmp.eq.s32.totalorder %v1217_v23, %v418_v57 }
  0xde   : > { %vm466_vm15 = vmor %vm352_vm13, %vm447_vm14 }
  0xdf   : > { %916 = vmatmul.mubr.msk.f32.gmra.mrb[6].mxu1 %vm466_vm15, %v1033_v29 }
  0xe0   : > { %918 = vmatprep.mubr.msk.f32.mxu1 %vm1031_vm0, %v1032_v32  ;;  %v406_v17 = vpop.permute.xlu0 %405 }
  0xe1   : > { %v185_v58 = vpop.permute.xlu1 %184 }
  0xe2   : > { %vm230_vm2 = vcmp.eq.s32.totalorder %v1217_v23, %v185_v58 }
  0xe6   : > { %v280_v60 = vpop.permute.xlu1 %279 }
  0xe7   : > { %vm325_vm3 = vcmp.eq.s32.totalorder %v1217_v23, %v280_v60 }
  0xe8   : > { %vm344_vm4 = vmor %vm230_vm2, %vm325_vm3  ;;  %vm240_vm2 = vcmp.eq.s32.totalorder %v1217_v23, %v1242_v40 }
  0xe9   : > { %vm458_vm5 = vmor %vm344_vm4, %vm439_vm1 }
  0xea   : > { %v307_v61 = vpop.permute.xlu1 %306  ;;  %892 = vmatmul.mubr.msk.f32.gmra.mrb[10].mxu0 %vm458_vm5, %v1033_v29 }
  0xeb   : > { %894 = vmatprep.mubr.msk.f32.mxu0 %vm1031_vm0, %v1032_v32  ;;  %vm334_vm7 = vcmp.eq.s32.totalorder %v1217_v23, %v307_v61 }
  0xec   : > { %vm353_vm8 = vmor %vm239_vm6, %vm334_vm7  ;;  %vm441_vm6 = vcmp.eq.s32.totalorder %v1217_v23, %v400_v7 }
  0xef   : > { %v421_v62 = vpop.permute.xlu1 %420 }
  0xf0   : > { %vm448_vm9 = vcmp.eq.s32.totalorder %v1217_v23, %v421_v62 }
  0xf1   : > { %vm467_vm10 = vmor %vm353_vm8, %vm448_vm9 }
  0xf2   : > { %919 = vmatmul.mubr.msk.f32.gmra.mrb[8].mxu1 %vm467_vm10, %v1033_v29 }
  0xf3   : > { %921 = vmatprep.mubr.msk.f32.mxu1 %vm1031_vm0, %v1032_v32 }
  0xf4   : > { %v188_v63 = vpop.permute.xlu1 %187 }
  0xf5   : > { %vm231_vm12 = vcmp.eq.s32.totalorder %v1217_v23, %v188_v63 }
  0xf9   : > { %v283_v3 = vpop.permute.xlu1 %282 }
  0xfa   : > { %vm326_vm13 = vcmp.eq.s32.totalorder %v1217_v23, %v283_v3 }
  0xfb   : > { %vm345_vm14 = vmor %vm231_vm12, %vm326_vm13  ;;  %vm241_vm12 = vcmp.eq.s32.totalorder %v1217_v23, %v1246_v43 }
  0xfc   : > { %vm459_vm15 = vmor %vm345_vm14, %vm440_vm11 }
  0xfd   : > { %v310_v4 = vpop.permute.xlu1 %309  ;;  %895 = vmatmul.mubr.msk.f32.gmra.mrb[12].mxu0 %vm459_vm15, %v1033_v29 }
  0xfe   : > { %897 = vmatprep.mubr.msk.f32.mxu0 %vm1031_vm0, %v1032_v32  ;;  %vm335_vm1 = vcmp.eq.s32.totalorder %v1217_v23, %v310_v4 }
  0xff   : > { %vm354_vm3 = vmor %vm240_vm2, %vm335_vm1 }
 0x102   : > { %v424_v5 = vpop.permute.xlu1 %423 }
 0x103   : > { %vm449_vm4 = vcmp.eq.s32.totalorder %v1217_v23, %v424_v5 }
 0x104   : > { %vm468_vm5 = vmor %vm354_vm3, %vm449_vm4  ;;  %vm442_vm3 = vcmp.eq.s32.totalorder %v1217_v23, %v403_v13 }
 0x105   : > { %922 = vmatmul.mubr.msk.f32.gmra.mrb[10].mxu1 %vm468_vm5, %v1033_v29 }
 0x106   : > { %924 = vmatprep.mubr.msk.f32.mxu1 %vm1031_vm0, %v1032_v32 }
 0x107   : > { %v191_v6 = vpop.permute.xlu1 %190 }
 0x108   : > { %vm232_vm7 = vcmp.eq.s32.totalorder %v1217_v23, %v191_v6 }
 0x10c   : > { %v286_v8 = vpop.permute.xlu1 %285 }
 0x10d   : > { %vm327_vm8 = vcmp.eq.s32.totalorder %v1217_v23, %v286_v8 }
 0x10e   : > { %vm346_vm9 = vmor %vm232_vm7, %vm327_vm8  ;;  %vm242_vm7 = vcmp.eq.s32.totalorder %v1217_v23, %v1252_v45 }
 0x10f   : > { %vm460_vm10 = vmor %vm346_vm9, %vm441_vm6 }
 0x110   : > { %v313_v9 = vpop.permute.xlu1 %312  ;;  %898 = vmatmul.mubr.msk.f32.gmra.mrb[14].mxu0 %vm460_vm10, %v1033_v29 }
 0x111   : > { %900 = vmatprep.mubr.msk.f32.mxu0 %vm1031_vm0, %v1032_v32  ;;  %vm336_vm11 = vcmp.eq.s32.totalorder %v1217_v23, %v313_v9 }
 0x112   : > { %vm355_vm13 = vmor %vm241_vm12, %vm336_vm11 }
 0x115   : > { %v427_v10 = vpop.permute.xlu1 %426 }
 0x116   : > { %vm450_vm14 = vcmp.eq.s32.totalorder %v1217_v23, %v427_v10 }
 0x117   : > { %vm469_vm15 = vmor %vm355_vm13, %vm450_vm14  ;;  %vm443_vm13 = vcmp.eq.s32.totalorder %v1217_v23, %v406_v17 }
 0x118   : > { %925 = vmatmul.mubr.msk.f32.gmra.mrb[12].mxu1 %vm469_vm15, %v1033_v29 }
 0x119   : > { %927 = vmatprep.mubr.msk.f32.mxu1 %vm1031_vm0, %v1032_v32 }
 0x11a   : > { %v194_v11 = vpop.permute.xlu1 %193 }
 0x11b   : > { %vm233_vm1 = vcmp.eq.s32.totalorder %v1217_v23, %v194_v11 }
 0x11f   : > { %v289_v12 = vpop.permute.xlu1 %288 }
 0x120   : > { %vm328_vm2 = vcmp.eq.s32.totalorder %v1217_v23, %v289_v12 }
 0x121   : > { %vm347_vm4 = vmor %vm233_vm1, %vm328_vm2 }
 0x122   : > { %vm461_vm5 = vmor %vm347_vm4, %vm442_vm3 }
 0x123   : > { %v316_v14 = vpop.permute.xlu1 %315  ;;  %901 = vmatmul.mubr.msk.f32.gmra.mrb[16].mxu0 %vm461_vm5, %v1033_v29  ;;  %vm686_vm5 = vcmask 261120  }
 0x124   : > { %903 = vmatprep.mubr.msk.f32.mxu0 %vm1031_vm0, %v1032_v32  ;;  %vm337_vm6 = vcmp.eq.s32.totalorder %v1217_v23, %v316_v14 }
 0x125   : > { %vm356_vm8 = vmor %vm242_vm7, %vm337_vm6 }
 0x128   : > { %v430_v15 = vpop.permute.xlu1 %429 }
 0x129   : > { %vm451_vm9 = vcmp.eq.s32.totalorder %v1217_v23, %v430_v15 }
 0x12a   : > { %vm470_vm10 = vmor %vm356_vm8, %vm451_vm9 }
 0x12b   : > { %928 = vmatmul.mubr.msk.f32.gmra.mrb[14].mxu1 %vm470_vm10, %v1033_v29 }
 0x12c   : > { %930 = vmatprep.mubr.msk.f32.mxu1 %vm1031_vm0, %v1032_v32  ;;  %vm243_vm0 = vcmp.eq.s32.totalorder %v1217_v23, %v1259_v47 }
 0x12d   : > { %v197_v16 = vpop.permute.xlu1 %196 }
 0x12e   : > { %vm234_vm11 = vcmp.eq.s32.totalorder %v1217_v23, %v197_v16 }
 0x132   : > { %v292_v18 = vpop.permute.xlu1 %291 }
 0x133   : > { %vm329_vm12 = vcmp.eq.s32.totalorder %v1217_v23, %v292_v18 }
 0x134   : > { %vm348_vm14 = vmor %vm234_vm11, %vm329_vm12 }
 0x135   : > { %vm462_vm15 = vmor %vm348_vm14, %vm443_vm13 }
 0x136   : > { %v319_v19 = vpop.permute.xlu1 %318  ;;  %904 = vmatmul.mubr.msk.f32.gmra.mrb[18].mxu0 %vm462_vm15, %v1033_v29 }
 0x137   : > { %vm338_vm1 = vcmp.eq.s32.totalorder %v1217_v23, %v319_v19 }
 0x138   : > { %vm357_vm2 = vmor %vm243_vm0, %vm338_vm1 }
 0x13b   : > { %v433_v32 = vpop.permute.xlu1 %432 }
 0x13c   : > { %vm452_vm3 = vcmp.eq.s32.totalorder %v1217_v23, %v433_v32 }
 0x13d   : > { %vm471_vm4 = vmor %vm357_vm2, %vm452_vm3 }
 0x13e   : > { %931 = vmatmul.mubr.msk.f32.gmra.mrb[16].mxu1 %vm471_vm4, %v1033_v29 }
 0x172   : > { %v592_v20 = vpop.f32.mrb[0].mxu0 }
 0x173   : > { %687 = vst.msk [vmem:[%s1366_s25] sm:$0xff] %vm686_vm5, %v592_v20  ;;  %v878_v21 = vpop.f32.mrb[1].mxu0 }
 0x179   : > { %v642_v22 = vpop.f32.mrb[0].mxu1 }
 0x17a   : > { %697 = vst.msk [vmem:[%s1366_s25 + $0x50] sm:$0xff] %vm686_vm5, %v642_v22  ;;  %v908_v23 = vpop.f32.mrb[1].mxu1 }
 0x18c   : > { %v647_v25 = vpop.f32.mrb[2].mxu1 }
 0x18d   : > { %698 = vst.msk [vmem:[%s1366_s25 + $0x58] sm:$0xff] %vm686_vm5, %v647_v25  ;;  %v911_v26 = vpop.f32.mrb[3].mxu1 }
 0x196   : > { %v597_v27 = vpop.f32.mrb[2].mxu0 }
 0x197   : > { %688 = vst.msk [vmem:[%s1366_s25 + $0x8] sm:$0xff] %vm686_vm5, %v597_v27  ;;  %v881_v28 = vpop.f32.mrb[3].mxu0 }
 0x19a   : > { %v602_v29 = vpop.f32.mrb[4].mxu0 }
 0x19b   : > { %689 = vst.msk [vmem:[%s1366_s25 + $0x10] sm:$0xff] %vm686_vm5, %v602_v29  ;;  %v884_v30 = vpop.f32.mrb[5].mxu0 }
 0x19e   : > { %v607_v31 = vpop.f32.mrb[6].mxu0 }
 0x19f   : > { %v652_v33 = vpop.f32.mrb[4].mxu1  ;;  %690 = vst.msk [vmem:[%s1366_s25 + $0x18] sm:$0xff] %vm686_vm5, %v607_v31  ;;  %v887_v34 = vpop.f32.mrb[7].mxu0 }
 0x1a0   : > { %699 = vst.msk [vmem:[%s1366_s25 + $0x60] sm:$0xff] %vm686_vm5, %v652_v33  ;;  %v914_v35 = vpop.f32.mrb[5].mxu1 }
 0x1aa   : > { %v612_v36 = vpop.f32.mrb[8].mxu0 }
 0x1ab   : > { %691 = vst.msk [vmem:[%s1366_s25 + $0x20] sm:$0xff] %vm686_vm5, %v612_v36  ;;  %v890_v37 = vpop.f32.mrb[9].mxu0 }
 0x1b2   : > { %v657_v38 = vpop.f32.mrb[6].mxu1 }
 0x1b3   : > { %700 = vst.msk [vmem:[%s1366_s25 + $0x68] sm:$0xff] %vm686_vm5, %v657_v38  ;;  %v917_v39 = vpop.f32.mrb[7].mxu1 }
 0x1bd   : > { %v617_v40 = vpop.f32.mrb[10].mxu0 }
 0x1be   : > { %692 = vst.msk [vmem:[%s1366_s25 + $0x28] sm:$0xff] %vm686_vm5, %v617_v40  ;;  %v893_v41 = vpop.f32.mrb[11].mxu0 }
 0x1c5   : > { %v662_v42 = vpop.f32.mrb[8].mxu1 }
 0x1c6   : > { %701 = vst.msk [vmem:[%s1366_s25 + $0x70] sm:$0xff] %vm686_vm5, %v662_v42  ;;  %v920_v43 = vpop.f32.mrb[9].mxu1 }
 0x1d0   : > { %v622_v44 = vpop.f32.mrb[12].mxu0 }
 0x1d1   : > { %693 = vst.msk [vmem:[%s1366_s25 + $0x30] sm:$0xff] %vm686_vm5, %v622_v44  ;;  %v896_v1 = vpop.f32.mrb[13].mxu0 }
 0x1d8   : > { %v667_v45 = vpop.f32.mrb[10].mxu1 }
 0x1d9   : > { %702 = vst.msk [vmem:[%s1366_s25 + $0x78] sm:$0xff] %vm686_vm5, %v667_v45  ;;  %v923_v46 = vpop.f32.mrb[11].mxu1 }
 0x1e3   : > { %v627_v2 = vpop.f32.mrb[14].mxu0 }
 0x1e4   : > { %694 = vst.msk [vmem:[%s1366_s25 + $0x38] sm:$0xff] %vm686_vm5, %v627_v2  ;;  %v899_v47 = vpop.f32.mrb[15].mxu0 }
 0x1eb   : > { %v672_v48 = vpop.f32.mrb[12].mxu1 }
 0x1ec   : > { %703 = vst.msk [vmem:[%s1366_s25 + $0x80] sm:$0xff] %vm686_vm5, %v672_v48  ;;  %v926_v50 = vpop.f32.mrb[13].mxu1 }
 0x1f6   : > { %v632_v24 = vpop.f32.mrb[16].mxu0 }
 0x1f7   : > { %695 = vst.msk [vmem:[%s1366_s25 + $0x40] sm:$0xff] %vm686_vm5, %v632_v24  ;;  %v902_v49 = vpop.f32.mrb[17].mxu0 }
 0x1fe   : > { %v677_v51 = vpop.f32.mrb[14].mxu1 }
 0x1ff   : > { %704 = vst.msk [vmem:[%s1366_s25 + $0x88] sm:$0xff] %vm686_vm5, %v677_v51  ;;  %v929_v52 = vpop.f32.mrb[15].mxu1 }
 0x209   : > { %v637_v53 = vpop.f32.mrb[18].mxu0 }
 0x20a   : > { %696 = vst.msk [vmem:[%s1366_s25 + $0x48] sm:$0xff] %vm686_vm5, %v637_v53  ;;  %v905_v54 = vpop.f32.mrb[19].mxu0 }
 0x211   : > { %v682_v55 = vpop.f32.mrb[16].mxu1 }
 0x212   : > { %705 = vst.msk [vmem:[%s1366_s25 + $0x90] sm:$0xff] %vm686_vm5, %v682_v55  ;;  %v932_v56 = vpop.f32.mrb[17].mxu1 }
 0x213 PF: > { %s12_s9 = sadd.s32 1, %s1025_s9  }
 0x214   : > { %p9_p4 = scmp.ge.s32.totalorder %s12_s9, 4  }
 0x216   :  { %11 = sbr.rel (!%p9_p4) target bundleno = 1 (0x1), region = 58 }

</bundles_post_ra>
